<compile_context>
chip_gen: v6e
topology: v6e:2x2x1
jax: 0.10.0
libtpu: 0.0.40
codegen_flags: <defaults>
</compile_context>

<pallas_src>
import math

import jax
import jax.numpy as jnp
from jax.experimental import pallas as pl
from jax.experimental.pallas import tpu as pltpu


def _vdrop_kernel(x_ref, eps_ref, alpha_ref, out_ref):
    # scale = eps * alpha; alpha is (1, W) and broadcasts over the row tile.
    scale = eps_ref[...] * alpha_ref[...]
    # Multiply in x's dtype (keeps bf16 packed on v6e/v7x; no-op cast for f32).
    out_ref[...] = (x_ref[...] * scale.astype(x_ref.dtype)).astype(out_ref.dtype)


def _fold_factor(M, H, lane=128, max_width=512):
    """Fold k rows into the lane axis so the last dim is a multiple of 128."""
    if H % lane == 0:
        return 1
    k = lane // math.gcd(H, lane)  # smallest k with (k*H) % 128 == 0
    if M % k != 0:
        return 1
    # Widen further (up to max_width lanes) while the row count stays divisible.
    while (2 * k * H) <= max_width and M % (2 * k) == 0:
        k *= 2
    return k


def _choose_block_rows(R, W, itemsize=4, target_bytes=1 << 20):
    """Largest divisor of R that is a multiple of 8 (or R itself) with ~target-sized blocks."""
    cap = max(1, target_bytes // (W * itemsize))
    if R <= cap:
        return R
    tm = (min(cap, R) // 8) * 8
    while tm >= 8:
        if R % tm == 0:
            return tm
        tm -= 8
    return R  # fallback: single block over all rows


def variational_dropout(x, log_alpha, max_alpha, key, *, training=True):
    """x: (..., H); log_alpha/max_alpha: (H,). Returns x * (eps * alpha) in training."""
    if not training:
        return x

    orig_shape = x.shape
    H = orig_shape[-1]
    M = math.prod(orig_shape[:-1])

    # clamp(log_alpha, max=max_alpha) -> exp, hoisted out of the kernel (O(H)).
    alpha = jnp.exp(
        jnp.minimum(log_alpha.astype(jnp.float32), jnp.asarray(max_alpha, jnp.float32))
    ).reshape(H)

    # epsilon ~ N(0, 1), same element count as x.
    eps = jax.random.normal(key, (M, H), dtype=jnp.float32)

    # Lane-dense layout: fold rows into the lane axis when H is not a multiple of 128.
    k = _fold_factor(M, H)
    R, W = M // k, k * H
    x2d = x.reshape(R, W)
    eps2d = eps.reshape(R, W)
    alpha_row = jnp.tile(alpha, k).reshape(1, W)

    tm = _choose_block_rows(R, W, itemsize=4)

    out2d = pl.pallas_call(
        _vdrop_kernel,
        out_shape=jax.ShapeDtypeStruct((R, W), x.dtype),
        grid=(R // tm,),
        in_specs=[
            pl.BlockSpec((tm, W), lambda i: (i, 0)),   # x
            pl.BlockSpec((tm, W), lambda i: (i, 0)),   # eps
            pl.BlockSpec((1, W), lambda i: (0, 0)),    # alpha (resident, per-feature)
        ],
        out_specs=pl.BlockSpec((tm, W), lambda i: (i, 0)),
        compiler_params=pltpu.CompilerParams(
            dimension_semantics=("parallel",),
        ),
    )(x2d, eps2d, alpha_row)

    return out2d.reshape(orig_shape)


if __name__ == "__main__":
    key = jax.random.PRNGKey(0)
    kx, keps = jax.random.split(key)

    B, S, H = 2, 8, 32
    x = jax.random.normal(kx, (B, S, H), dtype=jnp.float32)

    # Deterministic "parameter" init: alpha tensor passed to __init__.
    max_alpha = jnp.full((H,), 0.5, dtype=jnp.float32)   # self.max_alpha
    log_alpha = jnp.log(max_alpha)                       # self.log_alpha = alpha.log()

    out = variational_dropout(x, log_alpha, max_alpha, keps, training=True)
    out = jax.block_until_ready(out)

    assert out.shape == x.shape
    assert out.dtype == x.dtype
    assert bool(jnp.all(jnp.isfinite(out)))

    # Pure-JAX reference with the same epsilon stream.
    alpha_ref = jnp.exp(jnp.minimum(log_alpha, max_alpha))
    eps_ref = jax.random.normal(keps, (B * S, H), dtype=jnp.float32).reshape(B, S, H)
    ref = x * (eps_ref * alpha_ref)
    assert bool(jnp.allclose(out, ref, rtol=1e-6, atol=1e-6))

    # Eval mode is identity.
    out_eval = variational_dropout(x, log_alpha, max_alpha, keps, training=False)
    assert bool(jnp.allclose(out_eval, x))

    print("KERNEL_OK")
</pallas_src>

<mosaic_0001>
module attributes {stable_mosaic.version = 11 : i64} {
  func.func @_vdrop_kernel(%arg0: i32, %arg1: memref<1x512xf32, #tpu.memory_space<vmem>>, %arg2: memref<1x512xf32, #tpu.memory_space<vmem>>, %arg3: memref<1x512xf32, #tpu.memory_space<vmem>>, %arg4: memref<1x512xf32, #tpu.memory_space<vmem>>) attributes {dimension_semantics = [#tpu.dimension_semantics<parallel>], iteration_bounds = array<i64: 1>, scalar_prefetch = 0 : i64, scratch_operands = 0 : i64, tpu.core_type = #tpu.core_type<tc>, window_params = [{transform_indices = @transform_0, window_bounds = array<i64: 1, 512>}, {transform_indices = @transform_1, window_bounds = array<i64: 1, 512>}, {pipeline_mode = #tpu.pipeline_mode<synchronous>, transform_indices = @transform_2, window_bounds = array<i64: 1, 512>}, {transform_indices = @transform_3, window_bounds = array<i64: 1, 512>}]} {
    %c0 = arith.constant 0 : index
    %c0_0 = arith.constant 0 : index
    %0 = vector.load %arg2[%c0, %c0_0] : memref<1x512xf32, #tpu.memory_space<vmem>>, vector<1x512xf32>
    %c0_1 = arith.constant 0 : index
    %c0_2 = arith.constant 0 : index
    %1 = vector.load %arg3[%c0_1, %c0_2] : memref<1x512xf32, #tpu.memory_space<vmem>>, vector<1x512xf32>
    %2 = arith.mulf %0, %1 : vector<1x512xf32>
    %c0_3 = arith.constant 0 : index
    %c0_4 = arith.constant 0 : index
    %3 = vector.load %arg1[%c0_3, %c0_4] : memref<1x512xf32, #tpu.memory_space<vmem>>, vector<1x512xf32>
    %4 = arith.mulf %3, %2 : vector<1x512xf32>
    %c0_5 = arith.constant 0 : index
    %c0_6 = arith.constant 0 : index
    %5 = vector.load %arg4[%c0_5, %c0_6] : memref<1x512xf32, #tpu.memory_space<vmem>>, vector<1x512xf32>
    tpu.vector_store %arg4[%c0_5, %c0_6], %4 {strides = array<i32>} : memref<1x512xf32, #tpu.memory_space<vmem>>, vector<1x512xf32>,
    return
  }
  func.func @transform_0(%arg0: i32) -> (i32, i32) {
    %c0_i32 = arith.constant 0 : i32
    %c0_i32_0 = arith.constant 0 : i32
    return %arg0, %c0_i32 : i32, i32
  }
  func.func @transform_1(%arg0: i32) -> (i32, i32) {
    %c0_i32 = arith.constant 0 : i32
    %c0_i32_0 = arith.constant 0 : i32
    return %arg0, %c0_i32 : i32, i32
  }
  func.func @transform_2(%arg0: i32) -> (i32, i32) {
    %c0_i32 = arith.constant 0 : i32
    %c0_i32_0 = arith.constant 0 : i32
    %c0_i32_1 = arith.constant 0 : i32
    return %c0_i32, %c0_i32_0 : i32, i32
  }
  func.func @transform_3(%arg0: i32) -> (i32, i32) {
    %c0_i32 = arith.constant 0 : i32
    %c0_i32_0 = arith.constant 0 : i32
    return %arg0, %c0_i32 : i32, i32
  }
}

</mosaic_0001>

<bundles_post_ra>
// kernel: tpu_custom_call.1
= control target key start
LH: loop header
LB: loop body
LE: loop exit
PB: predicated region body
PF: predicated region fallthrough
CT: control target
= control target key end

     0   :  { %8 = vsyncpa [#allocation3], 0  ;;  %s202_s0 = inlined_call_operand.hbm [shape: f32[1,512], index: 0, kind: input, shape index: {}]   ;;  %s203_s1 = inlined_call_operand.hbm [shape: f32[1,512], index: 1, kind: input, shape index: {}]   ;;  %s204_s2 = inlined_call_operand.hbm [shape: f32[1,512], index: 2, kind: input, shape index: {}]   ;;  %s205_s3 = inlined_call_operand.hbm [shape: f32[1,512], index: 3, kind: output, shape index: {}]  }
   0x1   :  { %9 = vsyncpa [#allocation6], 0 }
   0x2   :  { %10 = vsyncpa [#allocation4], 0  ;;  %s166_s12 = smov [#allocation5]   ;;  %s167_s14 = smov [#allocation2]  }
   0x3   :  { %s27_s13 = sshll.u32 %s166_s12, 4  ;;  %s17_s15 = sshll.u32 %s167_s14, 4  ;;  %s28_s13 = int_to_ptr.vmem [resolvable:$true] %s27_s13  ;;  %s18_s15 = int_to_ptr.vmem [resolvable:$true] %s17_s15 }
   0x4   :  { %s88_s16 = scalar_lea.vmem %s28_s13, 64  ;;  %p93_p1 = scmp.lt.s32.totalorder %s28_s13, %s28_s13 }
   0x5   :  { %p89_p0 = scmp.ne.s32.totalorder %s28_s13, %s88_s16  ;;  %p94_p2 = scmp.lt.s32.totalorder %s88_s16, %s88_s16 }
   0x7   :  { %p95_p3 = por %p94_p2, %p93_p1 }
   0x9   :  { %p96_p4 = pnand %p95_p3, %p89_p0 }
   0xb   :  { %99 = shalt.err (!%p96_p4)
}
   0xc   :  { %30 = dma.hbm_to_vmem [thread:$0]  %s203_s1, 64, %s28_s13, [#allocation6]  }
   0xd   :  { %s108_s19 = scalar_lea.vmem %s18_s15, 64  ;;  %p113_p6 = scmp.lt.s32.totalorder %s18_s15, %s18_s15 }
   0xe   :  { %p109_p5 = scmp.ne.s32.totalorder %s18_s15, %s108_s19  ;;  %p114_p7 = scmp.lt.s32.totalorder %s108_s19, %s108_s19 }
  0x10   :  { %p115_p8 = por %p114_p7, %p113_p6 }
  0x12   :  { %p116_p9 = pnand %p115_p8, %p109_p5 }
  0x14   :  { %119 = shalt.err (!%p116_p9)
}
  0x15   :  { %20 = dma.hbm_to_vmem [thread:$0]  %s202_s0, 64, %s18_s15, [#allocation3]  }
  0x16   :  { %s168_s22 = smov [#allocation7]  }
  0x17   :  { %s37_s23 = sshll.u32 %s168_s22, 4  ;;  %s38_s23 = int_to_ptr.vmem [resolvable:$true] %s37_s23 }
  0x18   :  { %s128_s24 = scalar_lea.vmem %s38_s23, 64  ;;  %p133_p11 = scmp.lt.s32.totalorder %s38_s23, %s38_s23 }
  0x19   :  { %p129_p10 = scmp.ne.s32.totalorder %s38_s23, %s128_s24  ;;  %p134_p12 = scmp.lt.s32.totalorder %s128_s24, %s128_s24 }
  0x1b   :  { %p135_p13 = por %p134_p12, %p133_p11 }
  0x1d   :  { %p136_p0 = pnand %p135_p13, %p129_p10 }
  0x1f   :  { %139 = shalt.err (!%p136_p0)
}
  0x20   :  { %40 = dma.hbm_to_vmem [thread:$0]  %s204_s2, 64, %s38_s23, [#allocation6]  }
  0x21   :  { %160 = dma.done.wait [#allocation3], 64  }
  0x22   :  { %161 = vsyncadd [#allocation3], 4294967232 }
  0x23   :  { %162 = dma.done.wait [#allocation6], 128  }
  0x24   :  { %163 = vsyncadd [#allocation6], 4294967168  ;;  %v55_v0 = vlaneseq  ;;  %s169_s0 = smov [#allocation8]   ;;  %v50_v1 = vld [vmem:[#allocation5] sm:$0xf] }
  0x25   :  { %s66_s26 = sshll.u32 %s169_s0, 4  ;;  %v51_v2 = vld [vmem:[#allocation7] sm:$0xf]  ;;  %v53_v3 = vld [vmem:[#allocation2] sm:$0xf]  ;;  %s67_s26 = int_to_ptr.vmem [resolvable:$true] %s66_s26 }
  0x26   :  { %v52_v4 = vmul.f32 %v51_v2, %v50_v1  ;;  %vm57_vm0 = vcmp.lt.s32.totalorder %v55_v0, 512  ;;  %s140_s27 = scalar_lea.vmem %s67_s26, 64  ;;  %p145_p2 = scmp.lt.s32.totalorder %s67_s26, %s67_s26 }
  0x27   :  { %p141_p1 = scmp.ne.s32.totalorder %s67_s26, %s140_s27  ;;  %p146_p3 = scmp.lt.s32.totalorder %s140_s27, %s140_s27 }
  0x28   :  { %v54_v5 = vmul.f32 %v53_v3, %v52_v4 }
  0x29   :  { %p147_p4 = por %p146_p3, %p145_p2 }
  0x2a   :  { %59 = vst.msk [vmem:[#allocation8] sm:$0xf] %vm57_vm0, %v54_v5 }
  0x2b   :  { %p148_p5 = pnand %p147_p4, %p141_p1 }
  0x2d   :  { %151 = shalt.err (!%p148_p5)
}
  0x2e   :  { %69 = dma.vmem_to_hbm [thread:$0]  %s67_s26, 64, %s205_s3, [#allocation4]  }
  0x2f   :  { %164 = dma.done.wait [#allocation4], 64  }
  0x30   :  { %165 = vsyncadd [#allocation4], 4294967232 }
  0x31   :  { %73 = vsyncpa [#allocation3], 1 }
  0x32   :  { %74 = vsyncpa [#allocation6], 1 }
  0x33   :  { %75 = vsyncpa [#allocation4], 1 }

</bundles_post_ra>
